<compile_context>
chip_gen: v7x
topology: tpu7x:2x2x1
jax: 0.10.0
libtpu: 0.0.40
codegen_flags: <defaults>
</compile_context>

<pallas_src>
import jax
import jax.numpy as jnp
from jax.experimental import pallas as pl
from jax.experimental.pallas import tpu as pltpu


def _fused_kernel(wb_ref, x_ref, o_ref):
    # wb_ref: (12,) f32 SMEM = [w00 w01 w02 w10 w11 w12 w20 w21 w22 b0 b1 b2]
    # x_ref : (nb, 3, rt, 128) VMEM input tile  (batch, channel, sublane-row, lane)
    # o_ref : (9, nb, rt, 128) VMEM output tile; planes 0-2 = v6, 3-5 = v1, 6-8 = v3
    wgt = [wb_ref[i] for i in range(9)]          # hoisted scalar reads
    bia = [wb_ref[9 + i] for i in range(3)]

    x0 = x_ref[:, 0, :, :]                        # (nb, rt, 128) full-vreg slabs
    x1 = x_ref[:, 1, :, :]
    x2 = x_ref[:, 2, :, :]

    for co in range(3):
        v1 = (wgt[3 * co + 0] * x0
              + wgt[3 * co + 1] * x1
              + wgt[3 * co + 2] * x2
              + bia[co])
        v3 = jnp.maximum(v1 + 3.0, 0.0)           # clamp_min(v1 + 3, 0)
        v4 = jnp.minimum(v3, 6.0)                 # clamp_max(v3, 6)
        v6 = (v1 * v4) / 6.0                      # compute is fully hidden; / matches torch
        o_ref[co] = v6
        o_ref[3 + co] = v1
        o_ref[6 + co] = v3


def _cdiv(a, b):
    return (a + b - 1) // b


def _round_up(a, b):
    return _cdiv(a, b) * b


def _largest_divisor_leq(n, k):
    k = max(1, min(n, k))
    for d in range(k, 0, -1):
        if n % d == 0:
            return d
    return 1


def model_forward(x_nchw, weight, bias, *, max_rows_per_tile=1024, min_blocks=4):
    """x_nchw: (N, 3, H, W); weight: (3, 3) (Cout, Cin); bias: (3,).

    Returns (9, N*H*W) f32, identical to the PyTorch module's output.
    """
    n, cin, h, w = x_nchw.shape
    assert cin == 3 and weight.shape == (3, 3) and bias.shape == (3,)
    hw = h * w

    wb = jnp.concatenate([weight.reshape(-1), bias]).astype(jnp.float32)
    x = x_nchw.astype(jnp.float32).reshape(n, cin, hw)

    # ---- tiling selection (batch folded into the grid; no transpose ever) ----
    rows_needed = _cdiv(hw, 128)                  # sublane-rows needed per image
    r0 = max(8, _round_up(rows_needed, 8))        # per-image rows, (8,128)-aligned
    total_rows = n * r0
    # Target per-step rows: as big as possible (<= max_rows_per_tile), but keep
    # >= min_blocks grid steps when there is enough work (megacore / pipelining),
    # and never below 256 rows unless the whole problem is smaller than that.
    rows_per_step = min(max_rows_per_tile, total_rows,
                        max(256, _round_up(_cdiv(total_rows, min_blocks), 8)))
    rows_per_step = max(8, _round_up(rows_per_step, 8))

    if rows_per_step >= r0:
        # Batch tiling: one or more whole images per grid step.
        rows_tile = r0
        nb_tile = _largest_divisor_leq(n, max(1, rows_per_step // r0))
        blocks_per_batch = 1
        r = r0
    else:
        # Row tiling within each image; pad rows by at most one tile.
        nb_tile = 1
        blocks_per_batch = _cdiv(r0, rows_per_step)
        rows_tile = _round_up(_cdiv(r0, blocks_per_batch), 8)
        r = rows_tile * blocks_per_batch

    hw_pad = r * 128
    if hw_pad != hw:
        x = jnp.pad(x, ((0, 0), (0, 0), (0, hw_pad - hw)))
    x4 = x.reshape(n, cin, r, 128)

    grid = (n // nb_tile, blocks_per_batch)

    block_bytes = 12 * nb_tile * rows_tile * 128 * 4      # in(3)+out(9) planes
    vmem_limit = int(min(48 * 2**20, max(16 * 2**20, 2 * block_bytes + 6 * 2**20)))

    cost = pl.CostEstimate(
        flops=33 * n * hw,                # ~11 VALU ops per element per out-channel
        transcendentals=0,
        bytes_accessed=12 * n * hw_pad * 4 + wb.size * 4,
    )

    out4 = pl.pallas_call(
        _fused_kernel,
        out_shape=jax.ShapeDtypeStruct((9, n, r, 128), jnp.float32),
        grid_spec=pltpu.PrefetchScalarGridSpec(
            num_scalar_prefetch=0,
            grid=grid,
            in_specs=[
                pl.BlockSpec(memory_space=pltpu.MemorySpace.SMEM),     # (12,) w+b
                pl.BlockSpec((nb_tile, cin, rows_tile, 128),           # x tile
                             lambda i, j: (i, 0, j, 0)),
            ],
            out_specs=pl.BlockSpec((9, nb_tile, rows_tile, 128),
                                   lambda i, j: (0, i, j, 0)),
        ),
        compiler_params=pltpu.CompilerParams(
            dimension_semantics=("parallel", "parallel"),
            vmem_limit_bytes=vmem_limit),
        cost_estimate=cost,
    )(wb, x4)

    out = out4.reshape(9, n, hw_pad)
    if hw_pad != hw:
        out = out[:, :, :hw]              # drop zero-padded tail (garbage values)
    return out.reshape(9, n * hw)


def _reference(x_nchw, weight, bias):
    # Pure-JAX reference mirroring the PyTorch forward.
    v1 = jnp.einsum("nchw,oc->nohw", x_nchw, weight) + bias[None, :, None, None]
    v3 = jnp.maximum(v1 + 3.0, 0.0)
    v4 = jnp.minimum(v3, 6.0)
    v6 = v1 * v4 / 6.0
    l1 = jnp.concatenate([v6, v1, v3], axis=1)              # (N, 9, H, W)
    l2 = jnp.transpose(l1, (1, 0, 2, 3))                    # (9, N, H, W)
    return l2.reshape(9, -1)                                # (9, N*H*W)


if __name__ == "__main__":
    key = jax.random.PRNGKey(0)
    kw, kb, kx1, kx2 = jax.random.split(key, 4)

    # Deterministic Conv2d(3, 3, kernel_size=1) parameters.
    weight = jax.random.normal(kw, (3, 3), dtype=jnp.float32) * 0.5   # (Cout, Cin)
    bias = jax.random.normal(kb, (3,), dtype=jnp.float32) * 0.1

    # Aligned small shape (H*W multiple of 1024): batch-tiled, zero padding.
    N1, C, H1, W1 = 2, 3, 32, 32
    x1 = jax.random.normal(kx1, (N1, C, H1, W1), dtype=jnp.float32)
    out1 = jax.block_until_ready(model_forward(x1, weight, bias))
    ref1 = _reference(x1, weight, bias)
    assert out1.shape == (9, N1 * H1 * W1), out1.shape
    assert jnp.allclose(out1, ref1, atol=1e-5, rtol=1e-5), \
        float(jnp.max(jnp.abs(out1 - ref1)))

    # Non-aligned shape (H*W = 256): exercises the row-padding + output slice.
    N2, H2, W2 = 2, 16, 16
    x2 = jax.random.normal(kx2, (N2, C, H2, W2), dtype=jnp.float32)
    out2 = jax.block_until_ready(model_forward(x2, weight, bias))
    ref2 = _reference(x2, weight, bias)
    assert out2.shape == (9, N2 * H2 * W2), out2.shape
    assert jnp.allclose(out2, ref2, atol=1e-5, rtol=1e-5), \
        float(jnp.max(jnp.abs(out2 - ref2)))

    print("KERNEL_OK")
</pallas_src>

<mosaic_0001>
module attributes {stable_mosaic.version = 11 : i64} {
  func.func @_fused_kernel(%arg0: i32, %arg1: i32, %arg2: memref<12xf32, #tpu.memory_space<smem>>, %arg3: memref<2x3x8x128xf32, #tpu.memory_space<vmem>>, %arg4: memref<9x2x8x128xf32, #tpu.memory_space<vmem>>) attributes {dimension_semantics = [#tpu.dimension_semantics<parallel>, #tpu.dimension_semantics<parallel>], iteration_bounds = array<i64: 1, 1>, scalar_prefetch = 0 : i64, scratch_operands = 0 : i64, tpu.core_type = #tpu.core_type<tc>, window_params = [{transform_indices = @transform_0, window_bounds = array<i64: 12>}, {transform_indices = @transform_1, window_bounds = array<i64: 2, 3, 8, 128>}, {transform_indices = @transform_2, window_bounds = array<i64: 9, 2, 8, 128>}]} {
    %c0 = arith.constant 0 : index
    %0 = memref.load %arg2[%c0] : memref<12xf32, #tpu.memory_space<smem>>
    %c1 = arith.constant 1 : index
    %1 = memref.load %arg2[%c1] : memref<12xf32, #tpu.memory_space<smem>>
    %c2 = arith.constant 2 : index
    %2 = memref.load %arg2[%c2] : memref<12xf32, #tpu.memory_space<smem>>
    %c3 = arith.constant 3 : index
    %3 = memref.load %arg2[%c3] : memref<12xf32, #tpu.memory_space<smem>>
    %c4 = arith.constant 4 : index
    %4 = memref.load %arg2[%c4] : memref<12xf32, #tpu.memory_space<smem>>
    %c5 = arith.constant 5 : index
    %5 = memref.load %arg2[%c5] : memref<12xf32, #tpu.memory_space<smem>>
    %c6 = arith.constant 6 : index
    %6 = memref.load %arg2[%c6] : memref<12xf32, #tpu.memory_space<smem>>
    %c7 = arith.constant 7 : index
    %7 = memref.load %arg2[%c7] : memref<12xf32, #tpu.memory_space<smem>>
    %c8 = arith.constant 8 : index
    %8 = memref.load %arg2[%c8] : memref<12xf32, #tpu.memory_space<smem>>
    %c9 = arith.constant 9 : index
    %9 = memref.load %arg2[%c9] : memref<12xf32, #tpu.memory_space<smem>>
    %c10 = arith.constant 10 : index
    %10 = memref.load %arg2[%c10] : memref<12xf32, #tpu.memory_space<smem>>
    %c11 = arith.constant 11 : index
    %11 = memref.load %arg2[%c11] : memref<12xf32, #tpu.memory_space<smem>>
    %c0_0 = arith.constant 0 : index
    %c0_1 = arith.constant 0 : index
    %c0_2 = arith.constant 0 : index
    %c0_3 = arith.constant 0 : index
    %12 = vector.load %arg3[%c0_0, %c0_1, %c0_2, %c0_3] : memref<2x3x8x128xf32, #tpu.memory_space<vmem>>, vector<2x1x8x128xf32>
    %13 = vector.shape_cast %12 : vector<2x1x8x128xf32> to vector<2x8x128xf32>
    %c0_4 = arith.constant 0 : index
    %c1_5 = arith.constant 1 : index
    %c0_6 = arith.constant 0 : index
    %c0_7 = arith.constant 0 : index
    %14 = vector.load %arg3[%c0_4, %c1_5, %c0_6, %c0_7] : memref<2x3x8x128xf32, #tpu.memory_space<vmem>>, vector<2x1x8x128xf32>
    %15 = vector.shape_cast %14 : vector<2x1x8x128xf32> to vector<2x8x128xf32>
    %c0_8 = arith.constant 0 : index
    %c2_9 = arith.constant 2 : index
    %c0_10 = arith.constant 0 : index
    %c0_11 = arith.constant 0 : index
    %16 = vector.load %arg3[%c0_8, %c2_9, %c0_10, %c0_11] : memref<2x3x8x128xf32, #tpu.memory_space<vmem>>, vector<2x1x8x128xf32>
    %17 = vector.shape_cast %16 : vector<2x1x8x128xf32> to vector<2x8x128xf32>
    %18 = vector.broadcast %0 : f32 to vector<2x8x128xf32>
    %19 = arith.mulf %18, %13 : vector<2x8x128xf32>
    %20 = vector.broadcast %1 : f32 to vector<2x8x128xf32>
    %21 = arith.mulf %20, %15 : vector<2x8x128xf32>
    %22 = arith.addf %19, %21 : vector<2x8x128xf32>
    %23 = vector.broadcast %2 : f32 to vector<2x8x128xf32>
    %24 = arith.mulf %23, %17 : vector<2x8x128xf32>
    %25 = arith.addf %22, %24 : vector<2x8x128xf32>
    %26 = vector.broadcast %9 : f32 to vector<2x8x128xf32>
    %27 = arith.addf %25, %26 : vector<2x8x128xf32>
    %cst = arith.constant 3.000000e+00 : f32
    %28 = vector.broadcast %cst : f32 to vector<2x8x128xf32>
    %29 = arith.addf %27, %28 : vector<2x8x128xf32>
    %cst_12 = arith.constant 0.000000e+00 : f32
    %30 = vector.broadcast %cst_12 : f32 to vector<2x8x128xf32>
    %31 = arith.maximumf %29, %30 : vector<2x8x128xf32>
    %cst_13 = arith.constant 6.000000e+00 : f32
    %32 = vector.broadcast %cst_13 : f32 to vector<2x8x128xf32>
    %33 = arith.minimumf %31, %32 : vector<2x8x128xf32>
    %34 = arith.mulf %27, %33 : vector<2x8x128xf32>
    %cst_14 = arith.constant 6.000000e+00 : f32
    %35 = vector.broadcast %cst_14 : f32 to vector<2x8x128xf32>
    %36 = arith.divf %34, %35 : vector<2x8x128xf32>
    %c0_15 = arith.constant 0 : index
    %c0_16 = arith.constant 0 : index
    %c0_17 = arith.constant 0 : index
    %c0_18 = arith.constant 0 : index
    %37 = vector.load %arg4[%c0_15, %c0_16, %c0_17, %c0_18] : memref<9x2x8x128xf32, #tpu.memory_space<vmem>>, vector<1x2x8x128xf32>
    %38 = vector.shape_cast %37 : vector<1x2x8x128xf32> to vector<2x8x128xf32>
    %39 = vector.shape_cast %36 : vector<2x8x128xf32> to vector<1x2x8x128xf32>
    tpu.vector_store %arg4[%c0_15, %c0_16, %c0_17, %c0_18], %39 {strides = array<i32>} : memref<9x2x8x128xf32, #tpu.memory_space<vmem>>, vector<1x2x8x128xf32>,
    %c3_19 = arith.constant 3 : index
    %c0_20 = arith.constant 0 : index
    %c0_21 = arith.constant 0 : index
    %c0_22 = arith.constant 0 : index
    %40 = vector.load %arg4[%c3_19, %c0_20, %c0_21, %c0_22] : memref<9x2x8x128xf32, #tpu.memory_space<vmem>>, vector<1x2x8x128xf32>
    %41 = vector.shape_cast %40 : vector<1x2x8x128xf32> to vector<2x8x128xf32>
    %42 = vector.shape_cast %27 : vector<2x8x128xf32> to vector<1x2x8x128xf32>
    tpu.vector_store %arg4[%c3_19, %c0_20, %c0_21, %c0_22], %42 {strides = array<i32>} : memref<9x2x8x128xf32, #tpu.memory_space<vmem>>, vector<1x2x8x128xf32>,
    %c6_23 = arith.constant 6 : index
    %c0_24 = arith.constant 0 : index
    %c0_25 = arith.constant 0 : index
    %c0_26 = arith.constant 0 : index
    %43 = vector.load %arg4[%c6_23, %c0_24, %c0_25, %c0_26] : memref<9x2x8x128xf32, #tpu.memory_space<vmem>>, vector<1x2x8x128xf32>
    %44 = vector.shape_cast %43 : vector<1x2x8x128xf32> to vector<2x8x128xf32>
    %45 = vector.shape_cast %31 : vector<2x8x128xf32> to vector<1x2x8x128xf32>
    tpu.vector_store %arg4[%c6_23, %c0_24, %c0_25, %c0_26], %45 {strides = array<i32>} : memref<9x2x8x128xf32, #tpu.memory_space<vmem>>, vector<1x2x8x128xf32>,
    %46 = vector.broadcast %3 : f32 to vector<2x8x128xf32>
    %47 = arith.mulf %46, %13 : vector<2x8x128xf32>
    %48 = vector.broadcast %4 : f32 to vector<2x8x128xf32>
    %49 = arith.mulf %48, %15 : vector<2x8x128xf32>
    %50 = arith.addf %47, %49 : vector<2x8x128xf32>
    %51 = vector.broadcast %5 : f32 to vector<2x8x128xf32>
    %52 = arith.mulf %51, %17 : vector<2x8x128xf32>
    %53 = arith.addf %50, %52 : vector<2x8x128xf32>
    %54 = vector.broadcast %10 : f32 to vector<2x8x128xf32>
    %55 = arith.addf %53, %54 : vector<2x8x128xf32>
    %cst_27 = arith.constant 3.000000e+00 : f32
    %56 = vector.broadcast %cst_27 : f32 to vector<2x8x128xf32>
    %57 = arith.addf %55, %56 : vector<2x8x128xf32>
    %cst_28 = arith.constant 0.000000e+00 : f32
    %58 = vector.broadcast %cst_28 : f32 to vector<2x8x128xf32>
    %59 = arith.maximumf %57, %58 : vector<2x8x128xf32>
    %cst_29 = arith.constant 6.000000e+00 : f32
    %60 = vector.broadcast %cst_29 : f32 to vector<2x8x128xf32>
    %61 = arith.minimumf %59, %60 : vector<2x8x128xf32>
    %62 = arith.mulf %55, %61 : vector<2x8x128xf32>
    %cst_30 = arith.constant 6.000000e+00 : f32
    %63 = vector.broadcast %cst_30 : f32 to vector<2x8x128xf32>
    %64 = arith.divf %62, %63 : vector<2x8x128xf32>
    %c1_31 = arith.constant 1 : index
    %c0_32 = arith.constant 0 : index
    %c0_33 = arith.constant 0 : index
    %c0_34 = arith.constant 0 : index
    %65 = vector.load %arg4[%c1_31, %c0_32, %c0_33, %c0_34] : memref<9x2x8x128xf32, #tpu.memory_space<vmem>>, vector<1x2x8x128xf32>
    %66 = vector.shape_cast %65 : vector<1x2x8x128xf32> to vector<2x8x128xf32>
    %67 = vector.shape_cast %64 : vector<2x8x128xf32> to vector<1x2x8x128xf32>
    tpu.vector_store %arg4[%c1_31, %c0_32, %c0_33, %c0_34], %67 {strides = array<i32>} : memref<9x2x8x128xf32, #tpu.memory_space<vmem>>, vector<1x2x8x128xf32>,
    %c4_35 = arith.constant 4 : index
    %c0_36 = arith.constant 0 : index
    %c0_37 = arith.constant 0 : index
    %c0_38 = arith.constant 0 : index
    %68 = vector.load %arg4[%c4_35, %c0_36, %c0_37, %c0_38] : memref<9x2x8x128xf32, #tpu.memory_space<vmem>>, vector<1x2x8x128xf32>
    %69 = vector.shape_cast %68 : vector<1x2x8x128xf32> to vector<2x8x128xf32>
    %70 = vector.shape_cast %55 : vector<2x8x128xf32> to vector<1x2x8x128xf32>
    tpu.vector_store %arg4[%c4_35, %c0_36, %c0_37, %c0_38], %70 {strides = array<i32>} : memref<9x2x8x128xf32, #tpu.memory_space<vmem>>, vector<1x2x8x128xf32>,
    %c7_39 = arith.constant 7 : index
    %c0_40 = arith.constant 0 : index
    %c0_41 = arith.constant 0 : index
    %c0_42 = arith.constant 0 : index
    %71 = vector.load %arg4[%c7_39, %c0_40, %c0_41, %c0_42] : memref<9x2x8x128xf32, #tpu.memory_space<vmem>>, vector<1x2x8x128xf32>
    %72 = vector.shape_cast %71 : vector<1x2x8x128xf32> to vector<2x8x128xf32>
    %73 = vector.shape_cast %59 : vector<2x8x128xf32> to vector<1x2x8x128xf32>
    tpu.vector_store %arg4[%c7_39, %c0_40, %c0_41, %c0_42], %73 {strides = array<i32>} : memref<9x2x8x128xf32, #tpu.memory_space<vmem>>, vector<1x2x8x128xf32>,
    %74 = vector.broadcast %6 : f32 to vector<2x8x128xf32>
    %75 = arith.mulf %74, %13 : vector<2x8x128xf32>
    %76 = vector.broadcast %7 : f32 to vector<2x8x128xf32>
    %77 = arith.mulf %76, %15 : vector<2x8x128xf32>
    %78 = arith.addf %75, %77 : vector<2x8x128xf32>
    %79 = vector.broadcast %8 : f32 to vector<2x8x128xf32>
    %80 = arith.mulf %79, %17 : vector<2x8x128xf32>
    %81 = arith.addf %78, %80 : vector<2x8x128xf32>
    %82 = vector.broadcast %11 : f32 to vector<2x8x128xf32>
    %83 = arith.addf %81, %82 : vector<2x8x128xf32>
    %cst_43 = arith.constant 3.000000e+00 : f32
    %84 = vector.broadcast %cst_43 : f32 to vector<2x8x128xf32>
    %85 = arith.addf %83, %84 : vector<2x8x128xf32>
    %cst_44 = arith.constant 0.000000e+00 : f32
    %86 = vector.broadcast %cst_44 : f32 to vector<2x8x128xf32>
    %87 = arith.maximumf %85, %86 : vector<2x8x128xf32>
    %cst_45 = arith.constant 6.000000e+00 : f32
    %88 = vector.broadcast %cst_45 : f32 to vector<2x8x128xf32>
    %89 = arith.minimumf %87, %88 : vector<2x8x128xf32>
    %90 = arith.mulf %83, %89 : vector<2x8x128xf32>
    %cst_46 = arith.constant 6.000000e+00 : f32
    %91 = vector.broadcast %cst_46 : f32 to vector<2x8x128xf32>
    %92 = arith.divf %90, %91 : vector<2x8x128xf32>
    %c2_47 = arith.constant 2 : index
    %c0_48 = arith.constant 0 : index
    %c0_49 = arith.constant 0 : index
    %c0_50 = arith.constant 0 : index
    %93 = vector.load %arg4[%c2_47, %c0_48, %c0_49, %c0_50] : memref<9x2x8x128xf32, #tpu.memory_space<vmem>>, vector<1x2x8x128xf32>
    %94 = vector.shape_cast %93 : vector<1x2x8x128xf32> to vector<2x8x128xf32>
    %95 = vector.shape_cast %92 : vector<2x8x128xf32> to vector<1x2x8x128xf32>
    tpu.vector_store %arg4[%c2_47, %c0_48, %c0_49, %c0_50], %95 {strides = array<i32>} : memref<9x2x8x128xf32, #tpu.memory_space<vmem>>, vector<1x2x8x128xf32>,
    %c5_51 = arith.constant 5 : index
    %c0_52 = arith.constant 0 : index
    %c0_53 = arith.constant 0 : index
    %c0_54 = arith.constant 0 : index
    %96 = vector.load %arg4[%c5_51, %c0_52, %c0_53, %c0_54] : memref<9x2x8x128xf32, #tpu.memory_space<vmem>>, vector<1x2x8x128xf32>
    %97 = vector.shape_cast %96 : vector<1x2x8x128xf32> to vector<2x8x128xf32>
    %98 = vector.shape_cast %83 : vector<2x8x128xf32> to vector<1x2x8x128xf32>
    tpu.vector_store %arg4[%c5_51, %c0_52, %c0_53, %c0_54], %98 {strides = array<i32>} : memref<9x2x8x128xf32, #tpu.memory_space<vmem>>, vector<1x2x8x128xf32>,
    %c8_55 = arith.constant 8 : index
    %c0_56 = arith.constant 0 : index
    %c0_57 = arith.constant 0 : index
    %c0_58 = arith.constant 0 : index
    %99 = vector.load %arg4[%c8_55, %c0_56, %c0_57, %c0_58] : memref<9x2x8x128xf32, #tpu.memory_space<vmem>>, vector<1x2x8x128xf32>
    %100 = vector.shape_cast %99 : vector<1x2x8x128xf32> to vector<2x8x128xf32>
    %101 = vector.shape_cast %87 : vector<2x8x128xf32> to vector<1x2x8x128xf32>
    tpu.vector_store %arg4[%c8_55, %c0_56, %c0_57, %c0_58], %101 {strides = array<i32>} : memref<9x2x8x128xf32, #tpu.memory_space<vmem>>, vector<1x2x8x128xf32>,
    return
  }
  func.func @transform_0(%arg0: i32, %arg1: i32) -> i32 {
    %c0_i32 = arith.constant 0 : i32
    %c0_i32_0 = arith.constant 0 : i32
    return %c0_i32 : i32
  }
  func.func @transform_1(%arg0: i32, %arg1: i32) -> (i32, i32, i32, i32) {
    %c0_i32 = arith.constant 0 : i32
    %c0_i32_0 = arith.constant 0 : i32
    %c0_i32_1 = arith.constant 0 : i32
    return %arg0, %c0_i32, %arg1, %c0_i32_0 : i32, i32, i32, i32
  }
  func.func @transform_2(%arg0: i32, %arg1: i32) -> (i32, i32, i32, i32) {
    %c0_i32 = arith.constant 0 : i32
    %c0_i32_0 = arith.constant 0 : i32
    %c0_i32_1 = arith.constant 0 : i32
    return %c0_i32, %arg0, %arg1, %c0_i32_0 : i32, i32, i32, i32
  }
}

</mosaic_0001>

<bundles_post_ra>
// kernel: tpu_custom_call.1
= control target key start
LH: loop header
LB: loop body
LE: loop exit
PB: predicated region body
PF: predicated region fallthrough
CT: control target
= control target key end

     0   :  { %7 = vsyncpa [#allocation5], 0  ;;  %s345_s0 = inlined_call_operand.hbm [shape: f32[12], index: 0, kind: input, shape index: {}]   ;;  %s346_s1 = inlined_call_operand.hbm [shape: f32[2,3,8,128], index: 1, kind: input, shape index: {}]   ;;  %s347_s2 = inlined_call_operand.hbm [shape: f32[9,2,8,128], index: 2, kind: output, shape index: {}]  }
   0x1   :  { %8 = vsyncpa [#allocation3], 0 }
   0x2   :  { %9 = vsyncpa [#allocation4], 0  ;;  %s196_s11 = scalar_lea.hbm %s345_s0, 16 }
   0x3   :  { %p197_p0 = scmp.ne.s32.totalorder %s345_s0, %s196_s11  ;;  %p200_p1 = scmp.lt.u32.totalorder %s196_s11, %s345_s0 }
   0x5   :  { %p202_p2 = pnand %p200_p1, %p197_p0 }
   0x7   :  { %205 = shalt.err (!%p202_p2)
}
   0x8   :  { %s256_s16 = smov [#allocation2]   ;;  %s257_s19 = smov [#allocation6]  }
   0x9   :  { %17 = dma.hbm_to_smem %s345_s0, 16, %s256_s16, [#allocation5]  }
   0xa   :  { %s23_s20 = sshll.u32 %s257_s19, 4  ;;  %s206_s23 = scalar_lea.hbm %s346_s1, 768  ;;  %s24_s20 = int_to_ptr.vmem [resolvable:$true] %s23_s20 }
   0xb   :  { %p207_p3 = scmp.ne.s32.totalorder %s346_s1, %s206_s23  ;;  %p210_p4 = scmp.lt.u32.totalorder %s206_s23, %s346_s1 }
   0xd   :  { %p212_p5 = pnand %p210_p4, %p207_p3 }
   0xf   :  { %215 = shalt.err (!%p212_p5)
}
  0x10   :  { %s216_s28 = scalar_lea.vmem %s24_s20, 768  ;;  %p221_p7 = scmp.lt.s32.totalorder %s24_s20, %s24_s20 }
  0x11   :  { %p217_p6 = scmp.ne.s32.totalorder %s24_s20, %s216_s28  ;;  %p222_p8 = scmp.lt.s32.totalorder %s216_s28, %s216_s28 }
  0x13   :  { %p223_p9 = por %p222_p8, %p221_p7 }
  0x15   :  { %p224_p10 = pnand %p223_p9, %p217_p6 }
  0x17   :  { %227 = shalt.err (!%p224_p10)
}
  0x18   :  { %s258_s0 = smov 128   ;;  %s259_s29 = smov 8  }
  0x19   :  { %29 = dma.hbm_to_vmem [thread:$0]  %s346_s1, 768, %s24_s20, [#allocation3], %s258_s0, %s258_s0, %s259_s29  }
  0x1a   :  { %250 = dma.done.wait [#allocation5], 16  }
  0x1b   :  { %251 = vsyncadd [#allocation5], 4294967280 }
  0x1c   :  { %252 = dma.done.wait [#allocation3], 768  }
  0x1d   :  { %253 = vsyncadd [#allocation3], 4294966528 }
  0x1e   :  { %36 = sfence }
  0x1f   :  { %s37_s4 = sld [smem:[#allocation2]]  ;;  %s180_s5 = sld [smem:[#allocation2 + $0x1]]  ;;  %v49_v0 = vld [vmem:[#allocation6] sm:$0xff]  ;;  %v52_v1 = vld [vmem:[#allocation6 + $0x8] sm:$0xff]  ;;  %v55_v2 = vld [vmem:[#allocation6 + $0x10] sm:$0xff] }
  0x20   :  { %s181_s6 = sld [smem:[#allocation2 + $0x2]]  ;;  %s303_s7 = sld [smem:[#allocation2 + $0x9]]  ;;  %v50_v3 = vld [vmem:[#allocation6 + $0x18] sm:$0xff]  ;;  %v53_v4 = vld [vmem:[#allocation6 + $0x20] sm:$0xff]  ;;  %v56_v5 = vld [vmem:[#allocation6 + $0x28] sm:$0xff] }
  0x21   :  { %s305_s8 = sld [smem:[#allocation2 + $0x3]]  ;;  %s307_s9 = sld [smem:[#allocation2 + $0x4]] }
  0x22   :  { %s309_s10 = sld [smem:[#allocation2 + $0x5]]  ;;  %s311_s11 = sld [smem:[#allocation2 + $0xa]] }
  0x23   :  { %s313_s1 = sld [smem:[#allocation2 + $0x6]]  ;;  %s315_s12 = sld [smem:[#allocation2 + $0x7]] }
  0x24   :  { %s317_s13 = sld [smem:[#allocation2 + $0x8]]  ;;  %s320_s14 = sld [smem:[#allocation2 + $0xb]] }
  0x25   :  { %v57_v6 = vstv %s37_s4  ;;  %v60_v7 = vstv %s180_s5  ;;  %s260_s15 = smov [#allocation7]  }
  0x26   :  { %v58_v8 = vmul.f32 %v57_v6, %v49_v0  ;;  %v61_v9 = vmul.f32 %v60_v7, %v52_v1  ;;  %v65_v10 = vstv %s181_s6  ;;  %v70_v11 = vstv %s303_s7  ;;  %s167_s16 = sshll.u32 %s260_s15, 4  ;;  %s168_s16 = int_to_ptr.vmem [resolvable:$true] %s167_s16 }
  0x27   :  { %v66_v12 = vmul.f32 %v65_v10, %v55_v2  ;;  %v59_v13 = vmul.f32 %v57_v6, %v50_v3  ;;  %v62_v14 = vmul.f32 %v60_v7, %v53_v4  ;;  %v67_v15 = vmul.f32 %v65_v10, %v56_v5  ;;  %s228_s17 = scalar_lea.vmem %s168_s16, 2304  ;;  %p233_p12 = scmp.lt.s32.totalorder %s168_s16, %s168_s16 }
  0x28   :  { %v63_v16 = vadd.f32 %v61_v9, %v58_v8  ;;  %v92_v17 = vstv %s305_s8  ;;  %v95_v18 = vstv %s307_s9  ;;  %v100_v19 = vstv %s309_s10  ;;  %p229_p11 = scmp.ne.s32.totalorder %s168_s16, %s228_s17  ;;  %p234_p13 = scmp.lt.s32.totalorder %s228_s17, %s228_s17 }
  0x29   :  { %v64_v20 = vadd.f32 %v62_v14, %v59_v13  ;;  %v93_v21 = vmul.f32 %v92_v17, %v49_v0  ;;  %v96_v22 = vmul.f32 %v95_v18, %v52_v1  ;;  %v101_v23 = vmul.f32 %v100_v19, %v55_v2 }
  0x2a   :  { %v68_v24 = vadd.f32 %v66_v12, %v63_v16  ;;  %v105_v25 = vstv %s311_s11  ;;  %v94_v26 = vmul.f32 %v92_v17, %v50_v3  ;;  %v97_v27 = vmul.f32 %v95_v18, %v53_v4  ;;  %p235_p0 = por %p234_p13, %p233_p12 }
  0x2b   :  { %v69_v28 = vadd.f32 %v67_v15, %v64_v20  ;;  %v98_v29 = vadd.f32 %v96_v22, %v93_v21  ;;  %v102_v30 = vmul.f32 %v100_v19, %v56_v5  ;;  %v127_v31 = vstv %s313_s1 }
  0x2c   :  { %v71_v32 = vadd.f32 %v70_v11, %v68_v24  ;;  %v99_v33 = vadd.f32 %v97_v27, %v94_v26  ;;  %v128_v34 = vmul.f32 %v127_v31, %v49_v0  ;;  %v130_v35 = vstv %s315_s12  ;;  %p236_p1 = pnand %p235_p0, %p229_p11 }
  0x2d   :  { %v72_v36 = vadd.f32 %v70_v11, %v69_v28  ;;  %v103_v37 = vadd.f32 %v101_v23, %v98_v29  ;;  %v131_v38 = vmul.f32 %v130_v35, %v52_v1  ;;  %v135_v39 = vstv %s317_s13 }
  0x2e   :  { %v73_v40 = vadd.f32 3.0, %v71_v32  ;;  %87 = vst [vmem:[#allocation7 + $0x30] sm:$0xff] %v71_v32  ;;  %v104_v41 = vadd.f32 %v102_v30, %v99_v33  ;;  %v136_v42 = vmul.f32 %v135_v39, %v55_v2  ;;  %v140_v43 = vstv %s320_s14 }
  0x2f   :  { %v74_v44 = vadd.f32 3.0, %v72_v36  ;;  %88 = vst [vmem:[#allocation7 + $0x38] sm:$0xff] %v72_v36  ;;  %v106_v45 = vadd.f32 %v105_v25, %v103_v37  ;;  %v133_v46 = vadd.f32 %v131_v38, %v128_v34  ;;  %v129_v47 = vmul.f32 %v127_v31, %v50_v3 }
  0x30   :  { %v75_v48 = vmax.f32 %v73_v40, 0.0  ;;  %v107_v49 = vadd.f32 %v105_v25, %v104_v41  ;;  %v132_v50 = vmul.f32 %v130_v35, %v53_v4  ;;  %v137_v51 = vmul.f32 %v135_v39, %v56_v5 }
  0x31   :  { %v76_v52 = vmax.f32 %v74_v44, 0.0  ;;  %v108_v53 = vadd.f32 3.0, %v106_v45  ;;  %122 = vst [vmem:[#allocation7 + $0x40] sm:$0xff] %v106_v45  ;;  %v138_v54 = vadd.f32 %v136_v42, %v133_v46 }
  0x32   :  { %v77_v55 = vmin.f32 %v75_v48, 6.0  ;;  %90 = vst [vmem:[#allocation7 + $0x60] sm:$0xff] %v75_v48  ;;  %v109_v56 = vadd.f32 3.0, %v107_v49  ;;  %123 = vst [vmem:[#allocation7 + $0x48] sm:$0xff] %v107_v49  ;;  %v134_v57 = vadd.f32 %v132_v50, %v129_v47 }
  0x33   :  { %v78_v58 = vmin.f32 %v76_v52, 6.0  ;;  %91 = vst [vmem:[#allocation7 + $0x68] sm:$0xff] %v76_v52  ;;  %v110_v59 = vmax.f32 %v108_v53, 0.0  ;;  %v141_v60 = vadd.f32 %v140_v43, %v138_v54 }
  0x34   :  { %v79_v61 = vmul.f32 %v77_v55, %v71_v32  ;;  %v111_v62 = vmax.f32 %v109_v56, 0.0  ;;  %v139_v63 = vadd.f32 %v137_v51, %v134_v57 }
  0x35   :  { %v80_v0 = vmul.f32 %v78_v58, %v72_v36  ;;  %v112_v1 = vmin.f32 %v110_v59, 6.0  ;;  %125 = vst [vmem:[#allocation7 + $0x70] sm:$0xff] %v110_v59  ;;  %v143_v2 = vadd.f32 3.0, %v141_v60  ;;  %157 = vst [vmem:[#allocation7 + $0x50] sm:$0xff] %v141_v60 }
  0x36   :  { %v82_v3 = vmul.f32 0.16666667, %v79_v61  ;;  %v113_v4 = vmin.f32 %v111_v62, 6.0  ;;  %126 = vst [vmem:[#allocation7 + $0x78] sm:$0xff] %v111_v62  ;;  %v142_v5 = vadd.f32 %v140_v43, %v139_v63 }
  0x37   :  { %v83_v6 = vmul.f32 0.16666667, %v80_v0  ;;  %v114_v7 = vmul.f32 %v112_v1, %v106_v45  ;;  %v145_v8 = vmax.f32 %v143_v2, 0.0 }
  0x38   :  { %84 = vst [vmem:[#allocation7] sm:$0xff] %v82_v3  ;;  %v115_v9 = vmul.f32 %v113_v4, %v107_v49  ;;  %v144_v10 = vadd.f32 3.0, %v142_v5  ;;  %158 = vst [vmem:[#allocation7 + $0x58] sm:$0xff] %v142_v5 }
  0x39   :  { %85 = vst [vmem:[#allocation7 + $0x8] sm:$0xff] %v83_v6  ;;  %v116_v11 = vmul.f32 0.16666667, %v114_v7  ;;  %v147_v12 = vmin.f32 %v145_v8, 6.0  ;;  %160 = vst [vmem:[#allocation7 + $0x80] sm:$0xff] %v145_v8 }
  0x3a   :  { %v117_v13 = vmul.f32 0.16666667, %v115_v9  ;;  %v146_v14 = vmax.f32 %v144_v10, 0.0 }
  0x3b   :  { %119 = vst [vmem:[#allocation7 + $0x10] sm:$0xff] %v116_v11  ;;  %v149_v15 = vmul.f32 %v147_v12, %v141_v60 }
  0x3c   :  { %120 = vst [vmem:[#allocation7 + $0x18] sm:$0xff] %v117_v13  ;;  %v148_v16 = vmin.f32 %v146_v14, 6.0  ;;  %161 = vst [vmem:[#allocation7 + $0x88] sm:$0xff] %v146_v14 }
  0x3d   :  { %v151_v17 = vmul.f32 0.16666667, %v149_v15 }
  0x3e   :  { %v150_v18 = vmul.f32 %v148_v16, %v142_v5 }
  0x3f   :  { %154 = vst [vmem:[#allocation7 + $0x20] sm:$0xff] %v151_v17 }
  0x40   :  { %v152_v19 = vmul.f32 0.16666667, %v150_v18 }
  0x42   :  { %155 = vst [vmem:[#allocation7 + $0x28] sm:$0xff] %v152_v19 }
  0x43   :  { %239 = shalt.err (!%p236_p1)
}
  0x44   :  { %s240_s20 = scalar_lea.hbm %s347_s2, 2304 }
  0x45   :  { %p241_p2 = scmp.ne.s32.totalorder %s347_s2, %s240_s20  ;;  %p244_p3 = scmp.lt.u32.totalorder %s240_s20, %s347_s2 }
  0x47   :  { %p246_p4 = pnand %p244_p3, %p241_p2 }
  0x49   :  { %249 = shalt.err (!%p246_p4)
}
  0x4a   :  { %173 = dma.vmem_to_hbm [thread:$0]  %s168_s16, 2304, %s347_s2, [#allocation4], %s258_s0, %s258_s0, %s259_s29  }
  0x4b   :  { %254 = dma.done.wait [#allocation4], 2304  }
  0x4c   :  { %255 = vsyncadd [#allocation4], 4294964992 }
  0x4d   :  { %177 = vsyncpa [#allocation3], 1 }
  0x4e   :  { %178 = vsyncpa [#allocation4], 1 }
  0x4f   :  { %179 = vsyncpa [#allocation5], 1 }

</bundles_post_ra>
